<compile_context>
chip_gen: v7x
topology: tpu7x:2x2x1
jax: 0.10.0
libtpu: 0.0.40
codegen_flags: <defaults>
</compile_context>

<pallas_src>
import functools

import jax
import jax.numpy as jnp
from jax import lax
from jax.experimental import pallas as pl
from jax.experimental.pallas import tpu as pltpu


def _round_up(v, m):
    return (v + m - 1) // m * m


def _vmem_capacity_bytes():
    try:
        return int(pltpu.get_tpu_info().vmem_capacity_bytes)
    except Exception:
        return 64 * 1024 * 1024          # conservative (v7x per-core) fallback


def _vmem_bytes(tile_n, d, e):
    """Approximate VMEM footprint (bytes) for the chosen tiling."""
    x_io = 2 * (tile_n * d * 4) * 2          # x in + q out, double-buffered f32
    ind_io = 2 * tile_n * 4                  # (1, TN) int32 index row
    const = d * e * 4 + d * e * 2 + e * 4    # f32 + bf16 codebook + 0.5|e|^2 (1-buf)
    acc = 2 * (d * e + e) * 4                # embed_sum / csize accumulator blocks
    interm = 4 * tile_n * e * 4              # score / iota / onehot / select temps
    return x_io + ind_io + const + acc + interm


def _pick_tile_n(n, d, e, budget, vmem_cap):
    """Largest row tile that fits the VMEM budget (big tiles >> tiny tiles)."""
    cap = 2048 if vmem_cap >= (96 << 20) else 512     # v5e/v6e vs v7x
    n128 = _round_up(max(n, 1), 128)                  # lane-dense index row
    if n128 <= cap and _vmem_bytes(n128, d, e) <= budget:
        return n128                                   # single tile
    tile = cap
    while tile > 128 and _vmem_bytes(tile, d, e) > budget:
        tile //= 2
    # TODO(synk): if even (128, E) intermediates blow the budget (huge D*E
    # codebooks, esp. on v7x), add an E-tiled streaming-argmin grid axis.
    return tile


def _const_spec(shape, index_map):
    """Constant-index block: fetched once, so single-buffer it to save VMEM."""
    try:
        return pl.BlockSpec(shape, index_map, pipeline_mode=pl.Buffered(1))
    except TypeError:                                  # older jax w/o pipeline_mode
        return pl.BlockSpec(shape, index_map)


def _vq_kernel(x_ref, embed_f32_ref, embed_bf16_ref, e2h_ref,
               q_ref, ind_ref, embed_sum_ref, csize_ref,
               *, n_valid, has_pad, tiles_per_shard, use_bf16):
    s = pl.program_id(0)      # stat shard (parallel axis; megacore on v7x)
    t = pl.program_id(1)      # row tile within shard (arbitrary / accumulating)

    @pl.when(t == 0)
    def _():
        embed_sum_ref[...] = jnp.zeros_like(embed_sum_ref)
        csize_ref[...] = jnp.zeros_like(csize_ref)

    x = x_ref[...]                                   # (TN, D)
    tile_n = x.shape[0]
    e_f32 = embed_f32_ref[...]                       # (D, E) exact codebook
    n_embed = e_f32.shape[1]
    e2h = e2h_ref[...]                               # (1, E) = 0.5 * |embed|^2

    if use_bf16:   # bf16 MXU pass, f32 accumulate (default: ~3x MXU throughput)
        x_d = x.astype(jnp.bfloat16)
        e_d = embed_bf16_ref[...]                    # pre-cast once in the wrapper
    else:
        x_d = x.astype(jnp.float32)
        e_d = e_f32

    # score ∝ 0.5|e|^2 - x·e   (per-row |x|^2 and global scale are argmin-invariant)
    xe = jnp.dot(x_d, e_d, preferred_element_type=jnp.float32)        # (TN, E)
    score = e2h - xe

    # argmin along the lane axis, fully 2-D (first index wins on ties).
    min_score = jnp.min(score, axis=-1, keepdims=True)                # (TN, 1)
    iota = lax.broadcasted_iota(jnp.int32, (tile_n, n_embed), 1)
    ind_col = jnp.min(jnp.where(score <= min_score, iota, n_embed),
                      axis=-1, keepdims=True)                         # (TN, 1)

    if has_pad:   # static flag: fold pad mask into the index (cheap (TN,1) select)
        rows = ((s * tiles_per_shard + t) * tile_n
                + lax.broadcasted_iota(jnp.int32, (tile_n, 1), 0))
        ind_col = jnp.where(rows < n_valid, ind_col, n_embed)   # pad -> zero one-hot

    onehot = (iota == ind_col).astype(jnp.float32)                    # (TN, E)

    # quantize = onehot @ embed.T  -> exact f32 codebook rows (contract over E).
    q = lax.dot_general(onehot, e_f32, (((1,), (1,)), ((), ())),
                        preferred_element_type=jnp.float32)           # (TN, D)
    q_ref[...] = q.astype(q_ref.dtype)

    # Lane-dense (1, TN) index row via a tiny f32 MXU dot. Must stay f32:
    # bf16 only represents integers exactly up to 256.
    iota_row = lax.broadcasted_iota(jnp.int32, (1, n_embed), 1).astype(jnp.float32)
    ind_row = lax.dot_general(iota_row, onehot, (((1,), (1,)), ((), ())),
                              preferred_element_type=jnp.float32)     # (1, TN)
    ind_ref[...] = ind_row.astype(jnp.int32)

    # Per-shard training statistics, accumulated across the arbitrary axis.
    csize_ref[...] += jnp.sum(onehot, axis=0, keepdims=True)[None]    # (1,1,E)
    oh_d = onehot.astype(x_d.dtype)                                   # 0/1 exact in bf16
    esum = lax.dot_general(x_d, oh_d, (((0,), (0,)), ((), ())),       # x.T @ onehot
                           preferred_element_type=jnp.float32)        # (D, E)
    embed_sum_ref[...] += esum[None]


def vq_pallas(flatten, embed, *, use_bf16=True):
    """flatten: (N, D); embed: (D, E) float32 codebook.

    Returns:
      quantize  (N_pad, D)        exact codebook rows (zeros for pad rows)
      embed_ind (1, N_pad) int32  lane-dense index row
      embed_sum (D, E) f32        flatten.T @ one_hot(ind)
      counts    (1, E) f32        one_hot(ind).sum(0)
    """
    n, d = flatten.shape
    d2, e = embed.shape
    assert d2 == d

    vmem_cap = _vmem_capacity_bytes()
    budget = int(vmem_cap * 0.70)
    tile_n = _pick_tile_n(n, d, e, budget, vmem_cap)

    n_tiles = pl.cdiv(n, tile_n)
    num_shards = 2 if n_tiles >= 2 else 1     # stat shards; fills v7x's 2nd core
    n_pad = _round_up(n, tile_n * num_shards)
    tiles_per_shard = n_pad // (tile_n * num_shards)
    if n_pad != n:
        flatten = jnp.pad(flatten, ((0, n_pad - n), (0, 0)))

    embed_f32 = embed.astype(jnp.float32)
    embed_bf16 = embed_f32.astype(jnp.bfloat16)           # cast once, not per tile
    e2_half = 0.5 * jnp.sum(embed_f32 * embed_f32, axis=0, keepdims=True)

    kernel = functools.partial(
        _vq_kernel, n_valid=n, has_pad=(n_pad != n),
        tiles_per_shard=tiles_per_shard, use_bf16=use_bf16)

    out_shapes = (
        jax.ShapeDtypeStruct((n_pad, d), flatten.dtype),         # quantize
        jax.ShapeDtypeStruct((1, n_pad), jnp.int32),             # indices
        jax.ShapeDtypeStruct((num_shards, d, e), jnp.float32),   # per-shard embed_sum
        jax.ShapeDtypeStruct((num_shards, 1, e), jnp.float32),   # per-shard counts
    )

    vmem_limit = int(min(vmem_cap - (4 << 20),
                         max(32 << 20, _vmem_bytes(tile_n, d, e) + (8 << 20))))

    q_pad, ind_row, esum_sh, cnt_sh = pl.pallas_call(
        kernel,
        out_shape=out_shapes,
        grid_spec=pltpu.PrefetchScalarGridSpec(
            num_scalar_prefetch=0,
            grid=(num_shards, tiles_per_shard),
            in_specs=[
                pl.BlockSpec((tile_n, d),
                             lambda s, t: (s * tiles_per_shard + t, 0)),
                _const_spec((d, e), lambda s, t: (0, 0)),
                _const_spec((d, e), lambda s, t: (0, 0)),
                _const_spec((1, e), lambda s, t: (0, 0)),
            ],
            out_specs=[
                pl.BlockSpec((tile_n, d),
                             lambda s, t: (s * tiles_per_shard + t, 0)),
                pl.BlockSpec((1, tile_n),
                             lambda s, t: (0, s * tiles_per_shard + t)),
                pl.BlockSpec((1, d, e), lambda s, t: (s, 0, 0)),
                pl.BlockSpec((1, 1, e), lambda s, t: (s, 0, 0)),
            ],
        ),
        compiler_params=pltpu.CompilerParams(
            dimension_semantics=("parallel", "arbitrary"),
            vmem_limit_bytes=vmem_limit,
        ),
    )(flatten, embed_f32, embed_bf16, e2_half)

    # Tiny cross-shard reduction done in XLA.
    embed_sum = esum_sh.sum(axis=0)          # (D, E)
    counts = cnt_sh.sum(axis=0)              # (1, E)
    return q_pad, ind_row, embed_sum, counts


class VectorQuantizeJAX:
    """Functional JAX/Pallas port of VectorQuantize (training-mode forward)."""

    def __init__(self, dim, n_embed, decay=0.1, commitment=1.0, eps=1e-5,
                 seed=0, use_bf16=True):
        self.dim = dim
        self.n_embed = n_embed
        self.decay = decay          # matches the PyTorch spec's default/convention
        self.commitment = commitment
        self.eps = eps
        self.use_bf16 = use_bf16
        key = jax.random.PRNGKey(seed)
        embed = jax.random.normal(key, (dim, n_embed), dtype=jnp.float32)
        self.embed = embed
        self.embed_avg = embed
        self.cluster_size = jnp.zeros((n_embed,), dtype=jnp.float32)
        # TODO(synk): kmeans_init / init_embed_ lazy-init path not implemented
        # (initted is assumed True, matching the default kmeans_init=False).

    def forward(self, x, training=True):
        # x: (..., dim), channel-last.
        orig_shape = x.shape
        flatten = x.reshape(-1, self.dim)
        n = flatten.shape[0]

        q_flat, ind_flat, embed_sum, counts = vq_pallas(
            flatten, self.embed, use_bf16=self.use_bf16)

        quantize = q_flat[:n].reshape(orig_shape)
        embed_ind = ind_flat[0, :n].reshape(orig_shape[:-1])

        commit_loss = jnp.float32(0.0)
        if training:
            counts = counts[0]                        # (E,)
            # ema_inplace(buf, new, decay): buf = buf*decay + new*(1-decay)
            new_cluster_size = (self.cluster_size * self.decay
                                + counts * (1.0 - self.decay))
            new_embed_avg = (self.embed_avg * self.decay
                             + embed_sum * (1.0 - self.decay))
            total = new_cluster_size.sum()
            smoothed = ((new_cluster_size + self.eps)
                        / (total + self.n_embed * self.eps)) * total
            new_embed = new_embed_avg / smoothed[None, :]

            self.cluster_size = new_cluster_size
            self.embed_avg = new_embed_avg
            self.embed = new_embed

            # F.mse_loss(quantize.detach(), input) * commitment
            x_f32 = x.astype(jnp.float32)
            commit_loss = (jnp.mean((lax.stop_gradient(quantize).astype(jnp.float32)
                                     - x_f32) ** 2) * self.commitment)
            # straight-through: input + (quantize - input).detach()
            quantize = x + lax.stop_gradient(quantize.astype(x.dtype) - x)

        return quantize, embed_ind, commit_loss


def _check_quantization(x, embed, quantize, ind, dist_tol=0.5):
    """Validate kernel outputs: near-optimal code choice + exact codebook rows."""
    d = embed.shape[0]
    flat = x.reshape(-1, d).astype(jnp.float32)
    dist = (jnp.sum(flat ** 2, axis=1, keepdims=True)
            - 2.0 * flat @ embed
            + jnp.sum(embed ** 2, axis=0, keepdims=True))
    ind_flat = ind.reshape(-1)
    picked = jnp.take_along_axis(dist, ind_flat[:, None], axis=1)[:, 0]
    best = jnp.min(dist, axis=1)
    # bf16 distance path may flip exact/near ties; require near-optimality.
    assert jnp.all(picked <= best + dist_tol), "picked code not near-optimal"
    rows = embed.T[ind_flat]
    assert jnp.allclose(quantize.reshape(-1, d), rows, atol=1e-5, rtol=1e-5), \
        "quantize rows are not exact codebook entries"


if __name__ == "__main__":
    B, S, D, E = 2, 8, 32, 64
    key = jax.random.PRNGKey(0)
    k_x, _ = jax.random.split(key)
    x = jax.random.normal(k_x, (B, S, D), dtype=jnp.float32)

    vq = VectorQuantizeJAX(dim=D, n_embed=E, decay=0.1, commitment=1.0, seed=0)
    embed0 = vq.embed
    quantize, embed_ind, commit_loss = vq.forward(x, training=True)
    jax.block_until_ready((quantize, embed_ind, commit_loss))

    assert quantize.shape == x.shape and embed_ind.shape == (B, S)
    _check_quantization(x, embed0, quantize, embed_ind)
    q_rows = embed0.T[embed_ind.reshape(-1)].reshape(x.shape)
    # forward value of the straight-through quantize equals raw quantize rows
    assert jnp.allclose(quantize, q_rows, atol=1e-5, rtol=1e-5), "quantize mismatch"
    loss_exp = jnp.mean((q_rows - x) ** 2)
    assert jnp.allclose(commit_loss, loss_exp, atol=1e-5, rtol=1e-5), "loss mismatch"

    # --- padded / masked path (N = 15, not tile-aligned) ----------------------
    x_odd = jax.random.normal(jax.random.PRNGKey(1), (15, D), dtype=jnp.float32)
    q_o, ind_o, esum_o, cnt_o = vq_pallas(x_odd, embed0)
    jax.block_until_ready((q_o, ind_o, esum_o, cnt_o))
    _check_quantization(x_odd, embed0, q_o[:15], ind_o[0, :15])
    oh_o = jax.nn.one_hot(ind_o[0, :15], E, dtype=jnp.float32)
    assert jnp.allclose(cnt_o[0], oh_o.sum(0), atol=1e-3), "cluster-count mismatch"
    assert jnp.allclose(esum_o, x_odd.T @ oh_o, atol=0.05, rtol=0.02), \
        "embed_sum mismatch (padded path)"
    assert float(cnt_o[0].sum()) == 15.0, "pad rows leaked into counts"

    # --- multi-tile / sharded-statistics path ---------------------------------
    N_big = 2304
    x_big = jax.random.normal(jax.random.PRNGKey(2), (N_big, D), dtype=jnp.float32)
    q_b, ind_b, esum_b, cnt_b = vq_pallas(x_big, embed0)
    jax.block_until_ready((q_b, ind_b, esum_b, cnt_b))
    _check_quantization(x_big, embed0, q_b[:N_big], ind_b[0, :N_big])
    oh_b = jax.nn.one_hot(ind_b[0, :N_big], E, dtype=jnp.float32)
    assert jnp.allclose(cnt_b[0], oh_b.sum(0), atol=1e-2), "sharded count mismatch"
    assert float(cnt_b[0].sum()) == float(N_big), "sharded count total mismatch"
    assert jnp.allclose(esum_b, x_big.T @ oh_b, atol=0.8, rtol=0.05), \
        "sharded embed_sum mismatch"

    print("KERNEL_OK")
</pallas_src>

<mosaic_0001>
module attributes {stable_mosaic.version = 11 : i64} {
  func.func @_vq_kernel(%arg0: i32, %arg1: i32, %arg2: memref<128x32xf32, #tpu.memory_space<vmem>>, %arg3: memref<32x64xf32, #tpu.memory_space<vmem>>, %arg4: memref<32x64xbf16, #tpu.memory_space<vmem>>, %arg5: memref<1x64xf32, #tpu.memory_space<vmem>>, %arg6: memref<128x32xf32, #tpu.memory_space<vmem>>, %arg7: memref<1x128xi32, #tpu.memory_space<vmem>>, %arg8: memref<1x32x64xf32, #tpu.memory_space<vmem>>, %arg9: memref<1x1x64xf32, #tpu.memory_space<vmem>>) attributes {dimension_semantics = [#tpu.dimension_semantics<parallel>, #tpu.dimension_semantics<arbitrary>], iteration_bounds = array<i64: 1, 1>, scalar_prefetch = 0 : i64, scratch_operands = 0 : i64, tpu.core_type = #tpu.core_type<tc>, window_params = [{transform_indices = @transform_0, window_bounds = array<i64: 128, 32>}, {pipeline_mode = #tpu.pipeline_mode<synchronous>, transform_indices = @transform_1, window_bounds = array<i64: 32, 64>}, {pipeline_mode = #tpu.pipeline_mode<synchronous>, transform_indices = @transform_2, window_bounds = array<i64: 32, 64>}, {pipeline_mode = #tpu.pipeline_mode<synchronous>, transform_indices = @transform_3, window_bounds = array<i64: 1, 64>}, {transform_indices = @transform_4, window_bounds = array<i64: 128, 32>}, {transform_indices = @transform_5, window_bounds = array<i64: 1, 128>}, {transform_indices = @transform_6, window_bounds = array<i64: 1, 32, 64>}, {transform_indices = @transform_7, window_bounds = array<i64: 1, 1, 64>}]} {
    %c0_i32 = arith.constant 0 : i32
    %0 = arith.cmpi eq, %arg1, %c0_i32 : i32
    %1 = arith.extui %0 : i1 to i32
    %c0_i32_0 = arith.constant 0 : i32
    %2 = arith.cmpi ne, %1, %c0_i32_0 : i32
    scf.if %2 {
      %cst_31 = arith.constant 0.000000e+00 : f32
      %53 = vector.broadcast %cst_31 : f32 to vector<1x32x64xf32>
      %c0_32 = arith.constant 0 : index
      %c0_33 = arith.constant 0 : index
      %c0_34 = arith.constant 0 : index
      %54 = vector.load %arg8[%c0_32, %c0_33, %c0_34] : memref<1x32x64xf32, #tpu.memory_space<vmem>>, vector<1x32x64xf32>
      tpu.vector_store %arg8[%c0_32, %c0_33, %c0_34], %53 {strides = array<i32>} : memref<1x32x64xf32, #tpu.memory_space<vmem>>, vector<1x32x64xf32>,
      %cst_35 = arith.constant 0.000000e+00 : f32
      %55 = vector.broadcast %cst_35 : f32 to vector<1x1x64xf32>
      %c0_36 = arith.constant 0 : index
      %c0_37 = arith.constant 0 : index
      %c0_38 = arith.constant 0 : index
      %56 = vector.load %arg9[%c0_36, %c0_37, %c0_38] : memref<1x1x64xf32, #tpu.memory_space<vmem>>, vector<1x1x64xf32>
      tpu.vector_store %arg9[%c0_36, %c0_37, %c0_38], %55 {strides = array<i32>} : memref<1x1x64xf32, #tpu.memory_space<vmem>>, vector<1x1x64xf32>,
    } else {
    }
    %c0 = arith.constant 0 : index
    %c0_1 = arith.constant 0 : index
    %3 = vector.load %arg2[%c0, %c0_1] : memref<128x32xf32, #tpu.memory_space<vmem>>, vector<128x32xf32>
    %c0_2 = arith.constant 0 : index
    %c0_3 = arith.constant 0 : index
    %4 = vector.load %arg3[%c0_2, %c0_3] : memref<32x64xf32, #tpu.memory_space<vmem>>, vector<32x64xf32>
    %c0_4 = arith.constant 0 : index
    %c0_5 = arith.constant 0 : index
    %5 = vector.load %arg5[%c0_4, %c0_5] : memref<1x64xf32, #tpu.memory_space<vmem>>, vector<1x64xf32>
    %6 = arith.truncf %3 : vector<128x32xf32> to vector<128x32xbf16>
    %c0_6 = arith.constant 0 : index
    %c0_7 = arith.constant 0 : index
    %7 = vector.load %arg4[%c0_6, %c0_7] : memref<32x64xbf16, #tpu.memory_space<vmem>>, vector<32x64xbf16>
    %cst = arith.constant dense<0.000000e+00> : vector<128x64xf32>
    %8 = tpu.matmul %6, %7, %cst {dimension_numbers = #tpu.dot_dimension_numbers<[1], [0], [0], [1], [0, 0, 1, 1], [], []>} : vector<128x32xbf16>, vector<32x64xbf16>, vector<128x64xf32> -> vector<128x64xf32>
    %9 = vector.broadcast %5 : vector<1x64xf32> to vector<128x64xf32>
    %10 = arith.subf %9, %8 : vector<128x64xf32>
    %cst_8 = arith.constant dense<0x7F800000> : vector<128xf32>
    %11 = vector.multi_reduction <minimumf>, %10, %cst_8 [1] : vector<128x64xf32> to vector<128xf32>
    %12 = vector.shape_cast %11 : vector<128xf32> to vector<128x1xf32>
    %13 = tpu.iota {dimensions = array<i32: 1>} : vector<128x64xi32>
    %14 = vector.broadcast %12 : vector<128x1xf32> to vector<128x64xf32>
    %15 = arith.cmpf ole, %10, %14 : vector<128x64xf32>
    %c64_i32 = arith.constant 64 : i32
    %16 = vector.broadcast %c64_i32 : i32 to vector<128x64xi32>
    %17 = arith.select %15, %13, %16 : vector<128x64xi1>, vector<128x64xi32>
    %cst_9 = arith.constant dense<2147483647> : vector<128xi32>
    %18 = vector.multi_reduction <minsi>, %17, %cst_9 [1] : vector<128x64xi32> to vector<128xi32>
    %19 = vector.shape_cast %18 : vector<128xi32> to vector<128x1xi32>
    %c1_i32 = arith.constant 1 : i32
    %20 = arith.muli %arg0, %c1_i32 : i32
    %21 = arith.addi %20, %arg1 : i32
    %c128_i32 = arith.constant 128 : i32
    %22 = arith.muli %21, %c128_i32 : i32
    %23 = tpu.iota {dimensions = array<i32: 0>} : vector<128x1xi32>
    %24 = vector.broadcast %22 : i32 to vector<128x1xi32>
    %25 = arith.addi %24, %23 : vector<128x1xi32>
    %c16_i32 = arith.constant 16 : i32
    %26 = vector.broadcast %c16_i32 : i32 to vector<128x1xi32>
    %27 = arith.cmpi slt, %25, %26 : vector<128x1xi32>
    %c64_i32_10 = arith.constant 64 : i32
    %28 = vector.broadcast %c64_i32_10 : i32 to vector<128x1xi32>
    %29 = arith.select %27, %19, %28 : vector<128x1xi1>, vector<128x1xi32>
    %30 = vector.broadcast %29 : vector<128x1xi32> to vector<128x64xi32>
    %31 = arith.cmpi eq, %13, %30 : vector<128x64xi32>
    %32 = arith.extui %31 : vector<128x64xi1> to vector<128x64xi32>
    %33 = arith.sitofp %32 : vector<128x64xi32> to vector<128x64xf32>
    %cst_11 = arith.constant dense<0.000000e+00> : vector<128x32xf32>
    %34 = tpu.matmul %33, %4, %cst_11 {dimension_numbers = #tpu.dot_dimension_numbers<[1], [1], [0], [0], [0, 0, 1, 0], [], []>} : vector<128x64xf32>, vector<32x64xf32>, vector<128x32xf32> -> vector<128x32xf32>
    %c0_12 = arith.constant 0 : index
    %c0_13 = arith.constant 0 : index
    %35 = vector.load %arg6[%c0_12, %c0_13] : memref<128x32xf32, #tpu.memory_space<vmem>>, vector<128x32xf32>
    tpu.vector_store %arg6[%c0_12, %c0_13], %34 {strides = array<i32>} : memref<128x32xf32, #tpu.memory_space<vmem>>, vector<128x32xf32>,
    %36 = tpu.iota {dimensions = array<i32: 1>} : vector<1x64xi32>
    %37 = arith.sitofp %36 : vector<1x64xi32> to vector<1x64xf32>
    %cst_14 = arith.constant dense<0.000000e+00> : vector<1x128xf32>
    %38 = tpu.matmul %37, %33, %cst_14 {dimension_numbers = #tpu.dot_dimension_numbers<[1], [1], [0], [0], [0, 0, 1, 0], [], []>} : vector<1x64xf32>, vector<128x64xf32>, vector<1x128xf32> -> vector<1x128xf32>
    %39 = arith.fptosi %38 : vector<1x128xf32> to vector<1x128xi32>
    %c0_15 = arith.constant 0 : index
    %c0_16 = arith.constant 0 : index
    %40 = vector.load %arg7[%c0_15, %c0_16] : memref<1x128xi32, #tpu.memory_space<vmem>>, vector<1x128xi32>
    tpu.vector_store %arg7[%c0_15, %c0_16], %39 {strides = array<i32>} : memref<1x128xi32, #tpu.memory_space<vmem>>, vector<1x128xi32>,
    %c0_17 = arith.constant 0 : index
    %c0_18 = arith.constant 0 : index
    %c0_19 = arith.constant 0 : index
    %41 = vector.load %arg9[%c0_17, %c0_18, %c0_19] : memref<1x1x64xf32, #tpu.memory_space<vmem>>, vector<1x1x64xf32>
    %cst_20 = arith.constant dense<0.000000e+00> : vector<64xf32>
    %42 = vector.multi_reduction <add>, %33, %cst_20 [0] : vector<128x64xf32> to vector<64xf32>
    %43 = vector.shape_cast %42 : vector<64xf32> to vector<1x64xf32>
    %44 = vector.shape_cast %43 : vector<1x64xf32> to vector<1x1x64xf32>
    %45 = arith.addf %41, %44 : vector<1x1x64xf32>
    %c0_21 = arith.constant 0 : index
    %c0_22 = arith.constant 0 : index
    %c0_23 = arith.constant 0 : index
    %46 = vector.load %arg9[%c0_21, %c0_22, %c0_23] : memref<1x1x64xf32, #tpu.memory_space<vmem>>, vector<1x1x64xf32>
    tpu.vector_store %arg9[%c0_21, %c0_22, %c0_23], %45 {strides = array<i32>} : memref<1x1x64xf32, #tpu.memory_space<vmem>>, vector<1x1x64xf32>,
    %47 = arith.truncf %33 : vector<128x64xf32> to vector<128x64xbf16>
    %cst_24 = arith.constant dense<0.000000e+00> : vector<32x64xf32>
    %48 = tpu.matmul %6, %47, %cst_24 {dimension_numbers = #tpu.dot_dimension_numbers<[0], [0], [1], [1], [0, 1, 1, 1], [], []>} : vector<128x32xbf16>, vector<128x64xbf16>, vector<32x64xf32> -> vector<32x64xf32>
    %c0_25 = arith.constant 0 : index
    %c0_26 = arith.constant 0 : index
    %c0_27 = arith.constant 0 : index
    %49 = vector.load %arg8[%c0_25, %c0_26, %c0_27] : memref<1x32x64xf32, #tpu.memory_space<vmem>>, vector<1x32x64xf32>
    %50 = vector.shape_cast %48 : vector<32x64xf32> to vector<1x32x64xf32>
    %51 = arith.addf %49, %50 : vector<1x32x64xf32>
    %c0_28 = arith.constant 0 : index
    %c0_29 = arith.constant 0 : index
    %c0_30 = arith.constant 0 : index
    %52 = vector.load %arg8[%c0_28, %c0_29, %c0_30] : memref<1x32x64xf32, #tpu.memory_space<vmem>>, vector<1x32x64xf32>
    tpu.vector_store %arg8[%c0_28, %c0_29, %c0_30], %51 {strides = array<i32>} : memref<1x32x64xf32, #tpu.memory_space<vmem>>, vector<1x32x64xf32>,
    return
  }
  func.func @transform_0(%arg0: i32, %arg1: i32) -> (i32, i32) {
    %c1_i32 = arith.constant 1 : i32
    %0 = arith.muli %arg0, %c1_i32 : i32
    %1 = arith.addi %0, %arg1 : i32
    %c0_i32 = arith.constant 0 : i32
    %c0_i32_0 = arith.constant 0 : i32
    return %1, %c0_i32 : i32, i32
  }
  func.func @transform_1(%arg0: i32, %arg1: i32) -> (i32, i32) {
    %c0_i32 = arith.constant 0 : i32
    %c0_i32_0 = arith.constant 0 : i32
    %c0_i32_1 = arith.constant 0 : i32
    return %c0_i32, %c0_i32_0 : i32, i32
  }
  func.func @transform_2(%arg0: i32, %arg1: i32) -> (i32, i32) {
    %c0_i32 = arith.constant 0 : i32
    %c0_i32_0 = arith.constant 0 : i32
    %c0_i32_1 = arith.constant 0 : i32
    return %c0_i32, %c0_i32_0 : i32, i32
  }
  func.func @transform_3(%arg0: i32, %arg1: i32) -> (i32, i32) {
    %c0_i32 = arith.constant 0 : i32
    %c0_i32_0 = arith.constant 0 : i32
    %c0_i32_1 = arith.constant 0 : i32
    return %c0_i32, %c0_i32_0 : i32, i32
  }
  func.func @transform_4(%arg0: i32, %arg1: i32) -> (i32, i32) {
    %c1_i32 = arith.constant 1 : i32
    %0 = arith.muli %arg0, %c1_i32 : i32
    %1 = arith.addi %0, %arg1 : i32
    %c0_i32 = arith.constant 0 : i32
    %c0_i32_0 = arith.constant 0 : i32
    return %1, %c0_i32 : i32, i32
  }
  func.func @transform_5(%arg0: i32, %arg1: i32) -> (i32, i32) {
    %c1_i32 = arith.constant 1 : i32
    %0 = arith.muli %arg0, %c1_i32 : i32
    %1 = arith.addi %0, %arg1 : i32
    %c0_i32 = arith.constant 0 : i32
    %c0_i32_0 = arith.constant 0 : i32
    return %c0_i32, %1 : i32, i32
  }
  func.func @transform_6(%arg0: i32, %arg1: i32) -> (i32, i32, i32) {
    %c0_i32 = arith.constant 0 : i32
    %c0_i32_0 = arith.constant 0 : i32
    %c0_i32_1 = arith.constant 0 : i32
    return %arg0, %c0_i32, %c0_i32_0 : i32, i32, i32
  }
  func.func @transform_7(%arg0: i32, %arg1: i32) -> (i32, i32, i32) {
    %c0_i32 = arith.constant 0 : i32
    %c0_i32_0 = arith.constant 0 : i32
    %c0_i32_1 = arith.constant 0 : i32
    return %arg0, %c0_i32, %c0_i32_0 : i32, i32, i32
  }
}

</mosaic_0001>

<bundles_post_ra>
// kernel: tpu_custom_call.1
= control target key start
LH: loop header
LB: loop body
LE: loop exit
PB: predicated region body
PF: predicated region fallthrough
CT: control target
= control target key end

     0   :  { %13 = vsyncpa [#allocation3], 0  ;;  %vm117_vm0 = vcmask 261120   ;;  %s1945_s0 = inlined_call_operand.vmem [shape: f32[128,32], index: 0, kind: input, shape index: {}]   ;;  %s1946_s1 = inlined_call_operand.vmem [shape: f32[32,64], index: 1, kind: input, shape index: {}]   ;;  %s1947_s2 = inlined_call_operand.vmem [shape: bf16[32,64], index: 2, kind: input, shape index: {}]   ;;  %s1948_s3 = inlined_call_operand.vmem [shape: f32[1,64], index: 3, kind: input, shape index: {}]   ;;  %s1949_s4 = inlined_call_operand.vmem [shape: f32[128,32], index: 4, kind: output, shape index: {0}]   ;;  %s1950_s5 = inlined_call_operand.hbm [shape: s32[1,128], index: 5, kind: output, shape index: {1}]   ;;  %s1951_s6 = inlined_call_operand.hbm [shape: f32[1,32,64], index: 6, kind: output, shape index: {2}]   ;;  %s1952_s7 = inlined_call_operand.hbm [shape: f32[1,1,64], index: 7, kind: output, shape index: {3}]  }
   0x1   :  { %v1500_v0 = vld [vmem:[%s1947_s2] sm:$0xff]   ;;  %v1501_v1 = vld [vmem:[%s1947_s2 + $0x8] sm:$0xff]   ;;  %v74_v5 = vld [vmem:[%s1945_s0 + $0x10] sm:$0xff] }
   0x2   :  { %1338 = vmatprep.subr.bf16.mxu0 %v1500_v0  ;;  %v72_v2 = vld [vmem:[%s1945_s0] sm:$0xff]  ;;  %v73_v3 = vld [vmem:[%s1945_s0 + $0x8] sm:$0xff]  ;;  %v75_v6 = vld [vmem:[%s1945_s0 + $0x18] sm:$0xff] }
   0x3   :  { %1339 = vmatpush3.bf16.msra.mxu0 %v1500_v0  ;;  %v1633_v4 = vpack.c.bf16 %v73_v3, %v72_v2 }
   0x4   :  { %14 = vsyncpa [#allocation5], 0  ;;  %1340 = vmatprep.subr.bf16.mxu0 %v1501_v1  ;;  %v1643_v7 = vpack.c.bf16 %v75_v6, %v74_v5  ;;  %v1211_v8 = vld [vmem:[%s1948_s3] ss:$0 sm:$0xff]  ;;  %vm65_vm1 = vcmask 523264   ;;  %v310_v17 = vlaneseq  ;;  %v77_v30 = vld [vmem:[%s1945_s0 + $0x28] sm:$0xff] }
   0x5   :  { %1342 = vmatprep.mubr.msk.bf16.mxu0 %vm117_vm0, %v1633_v4  ;;  %v76_v29 = vld [vmem:[%s1945_s0 + $0x20] sm:$0xff]  ;;  %v78_v32 = vld [vmem:[%s1945_s0 + $0x30] sm:$0xff]  ;;  %v79_v33 = vld [vmem:[%s1945_s0 + $0x38] sm:$0xff]  ;;  %v1572_v62 = vmov 0.0   ;;  %v1573_v63 = vmov 0.0|0.0   ;;  %vm70_vm7 = vcmask 516096  }
   0x6   :  { %v1652_v18 = vand.u32 127, %v310_v17  ;;  %v95_v31 = vpack.c.bf16 %v77_v30, %v76_v29  ;;  %v96_v34 = vpack.c.bf16 %v79_v33, %v78_v32  ;;  %v80_v35 = vld [vmem:[%s1945_s0 + $0x40] sm:$0xff]  ;;  %v81_v36 = vld [vmem:[%s1945_s0 + $0x48] sm:$0xff]  ;;  %v82_v38 = vld [vmem:[%s1945_s0 + $0x50] sm:$0xff]  ;;  %66 = vst.msk [vmem:[#allocation4] sm:$0xff] %vm65_vm1, %v1572_v62  ;;  %vm1574_vm8 = vmmov 0  }
   0x7   :  { %1341 = vmatpush3.bf16.msra.mxu0 %v1501_v1  ;;  %v97_v37 = vpack.c.bf16 %v81_v36, %v80_v35  ;;  %v83_v39 = vld [vmem:[%s1945_s0 + $0x58] sm:$0xff]  ;;  %v84_v41 = vld [vmem:[%s1945_s0 + $0x60] sm:$0xff]  ;;  %v85_v42 = vld [vmem:[%s1945_s0 + $0x68] sm:$0xff]  ;;  %67 = vst.msk [vmem:[#allocation4 + $0x8] sm:$0xff] %vm65_vm1, %v1572_v62  ;;  %s1576_s23 = smov [#allocation4]   ;;  %s1577_s25 = smov [#allocation6]  }
   0x8   :  { %v98_v40 = vpack.c.bf16 %v83_v39, %v82_v38  ;;  %v99_v43 = vpack.c.bf16 %v85_v42, %v84_v41  ;;  %v86_v44 = vld [vmem:[%s1945_s0 + $0x70] sm:$0xff]  ;;  %v87_v45 = vld [vmem:[%s1945_s0 + $0x78] sm:$0xff]  ;;  %v88_v47 = vld [vmem:[%s1946_s1] sm:$0xff]  ;;  %68 = vst.msk [vmem:[#allocation4 + $0x10] sm:$0xff] %vm65_vm1, %v1572_v62  ;;  %1457 = vmatprep.subr.bf16.mxu0 %v1573_v63  ;;  %vm654_vm9 = vcmp.eq.s32.totalorder %v1652_v18, 64  ;;  %s1151_s24 = sshll.u32 %s1576_s23, 4  ;;  %s1152_s24 = int_to_ptr.vmem [resolvable:$true] %s1151_s24 }
   0x9   :  { %v100_v46 = vpack.c.bf16 %v87_v45, %v86_v44  ;;  %v89_v48 = vld [vmem:[%s1946_s1 + $0x8] sm:$0xff]  ;;  %vm1708_vm4 = vmpackc.low %vm65_vm1, %vm65_vm1  ;;  %v90_v59 = vld [vmem:[%s1946_s1 + $0x10] sm:$0xff]  ;;  %69 = vst.msk [vmem:[#allocation4 + $0x18] sm:$0xff] %vm65_vm1, %v1572_v62  ;;  %v1737_v17 = vsel %vm654_vm9, 1.0, %v1572_v62  ;;  %s1164_s26 = sshll.u32 %s1577_s25, 4  ;;  %p1507_p1 = scmp.lt.s32.totalorder %s1152_s24, %s1152_s24  ;;  %s1900_s26 = int_to_ptr.vmem [resolvable:$true] %s1164_s26 }
   0xa   :  { %1343 = vmatmul.mubr.msk.bf16.vlgmr.msra.gmra.mrb[0].mxu0 %vm117_vm0, %v1643_v7  ;;  %v1445_v50 = vpack.c.bf16 %v89_v48, %v88_v47  ;;  %v91_v60 = vld [vmem:[%s1946_s1 + $0x18] sm:$0xff]  ;;  %71 = vst.msk [vmem:[#allocation6] sm:$0x1] %vm70_vm7, %v1572_v62  ;;  %vm1739_vm11 = vmpackc.low %vm654_vm9, %vm654_vm9 }
   0xb   :  { %1346 = vmatprep.mubr.msk.bf16.mxu0 %vm117_vm0, %v95_v31  ;;  %v1451_v61 = vpack.c.bf16 %v91_v60, %v90_v59  ;;  %v921_v59 = vcvt.s32.f32 %v1652_v18 }
   0xc   :  { %1447 = vmatprep.subr.msk.bf16.mxu1 %vm1708_vm4, %v1445_v50 }
   0xd   :  { %1450 = vmatpush3.bf16.xpose.msk.msra.mxu1 %vm1708_vm4, %v1445_v50 }
   0xe   :  { %1453 = vmatprep.subr.msk.bf16.mxu1 %vm1708_vm4, %v1451_v61 }
  0x12   :  { %1347 = vmatmul.mubr.msk.bf16.gmra.mrb[4].mxu0 %vm117_vm0, %v96_v34 }
  0x13   :  { %1350 = vmatprep.mubr.msk.bf16.mxu0 %vm117_vm0, %v97_v37 }
  0x15   :  { %1456 = vmatpush3.bf16.xpose.msk.msra.mxu1 %vm1708_vm4, %v1451_v61 }
  0x1a   :  { %1351 = vmatmul.mubr.msk.bf16.gmra.mrb[8].mxu0 %vm117_vm0, %v98_v40 }
  0x1b   :  { %1354 = vmatprep.mubr.msk.bf16.mxu0 %vm117_vm0, %v99_v43 }
  0x22   :  { %1355 = vmatmul.mubr.msk.bf16.gmra.mrb[12].mxu0 %vm117_vm0, %v100_v46 }
  0x23   :  { %1422 = vmatprep.mubr.msk.f32.mxu0 %vm1574_vm8, %v1572_v62 }
  0xdd   :  { %v1344_v9 = vpop.f32.mrb[0].mxu0 }
  0xde   :  { %v176_v10 = vpop.f32.mrb[1].mxu0 }
  0xdf   :  { %v245_v11 = vsub.f32 %v1211_v8, %v176_v10  ;;  %v1345_v12 = vpop.f32.mrb[2].mxu0 }
  0xe0   :  { %v179_v13 = vpop.f32.mrb[3].mxu0 }
  0xe1   :  { %v246_v14 = vsub.f32 %v1211_v8, %v179_v13  ;;  %v262_v15 = vsel %vm65_vm1, %v245_v11, inf }
  0xe2   :  { %263 = vmin.xlane.f32.xlu0 %v262_v15 }
  0xe3   :  { %v265_v16 = vsel %vm65_vm1, %v246_v14, inf }
  0xe5   :  { %v1348_v1 = vpop.f32.mrb[4].mxu0 }
  0xe6   :  { %266 = vmin.xlane.f32.xlu0 %v265_v16  ;;  %v192_v2 = vpop.f32.mrb[5].mxu0 }
  0xe7   :  { %v1349_v5 = vpop.f32.mrb[6].mxu0 }
 0x16f   :  { %v264_v19 = vpop.xlane.xlu0 %263 }
 0x170   :  { %vm312_vm2 = vcmp.le.f32.partialorder %v245_v11, %v264_v19 }
 0x171   :  { %v328_v20 = vsel %vm312_vm2, %v1652_v18, 64 }
 0x172   :  { %v344_v21 = vsel %vm65_vm1, %v328_v20, 2147483647 }
 0x173   :  { %v267_v22 = vpop.xlane.xlu0 %266  ;;  %v346_v23 = vshra.s32 %v344_v21, 16  ;;  %v345_v51 = vand.u32 65535, %v344_v21 }
 0x174   :  { %vm313_vm3 = vcmp.le.f32.partialorder %v246_v14, %v267_v22 }
 0x175   :  { %v329_v24 = vsel %vm313_vm3, %v1652_v18, 64  ;;  %v348_v25 = vcvt.s32.f32 %v346_v23  ;;  %v347_v53 = vcvt.s32.f32 %v345_v51 }
 0x176   :  { %v359_v26 = vsel %vm65_vm1, %v329_v24, 2147483647 }
 0x177   :  { %349 = vmin.xlane.f32.xlu1 %v348_v25  ;;  %v361_v27 = vshra.s32 %v359_v26, 16  ;;  %v360_v54 = vand.u32 65535, %v359_v26  ;;  %v1001_v26 = vsel %vm65_vm1, %v1737_v17, 0.0 }
 0x179   :  { %v363_v28 = vcvt.s32.f32 %v361_v27  ;;  %v362_v57 = vcvt.s32.f32 %v360_v54  ;;  %v1575_v27 = vmov 1.0|1.0  }
 0x17b   :  { %364 = vmin.xlane.f32.xlu1 %v363_v28 }
 0x204   :  { %v350_v52 = vpop.xlane.xlu1 %349 }
 0x205   :  { %vm351_vm5 = vcmp.eq.f32.partialorder %v348_v25, %v350_v52  ;;  %v356_v0 = vcvt.f32.s32 %v350_v52 }
 0x206   :  { %v352_v55 = vsel %vm351_vm5, %v347_v53, inf }
 0x207   :  { %353 = vmin.xlane.f32.xlu0 %v352_v55  ;;  %v357_v6 = vshll.u32 %v356_v0, 16 }
 0x208   :  { %v365_v56 = vpop.xlane.xlu1 %364 }
 0x209   :  { %vm366_vm6 = vcmp.eq.f32.partialorder %v363_v28, %v365_v56 }
 0x20a   :  { %v367_v58 = vsel %vm366_vm6, %v362_v57, inf }
 0x20b   :  { %368 = vmin.xlane.f32.xlu1 %v367_v58 }
 0x234   :  { %1046 = vxpose.xlu0.c.b16.start [1/8] (narrow) %v1633_v4, 32  ;;  %v371_v4 = vcvt.f32.s32 %v365_v56  ;;  %v997_v56 = vld [vmem:[#allocation6] sm:$0x1] }
 0x236   :  { %v372_v11 = vshll.u32 %v371_v4, 16 }
 0x238   :  { %1047 = vxpose.xlu0.c.b16.cont [2/8] (narrow) %v1643_v7, 32  ;;  %v195_v7 = vpop.f32.mrb[7].mxu0 }
 0x239   :  { %v1352_v14 = vpop.f32.mrb[8].mxu0 }
 0x23a   :  { %v208_v16 = vpop.f32.mrb[9].mxu0 }
 0x23b   :  { %v1353_v19 = vpop.f32.mrb[10].mxu0  ;;  %v1112_v16 = vld [vmem:[#allocation4 + $0x8] sm:$0xff] }
 0x23c   :  { %1048 = vxpose.xlu0.c.b16.cont [3/8] (narrow) %v95_v31, 32  ;;  %v211_v21 = vpop.f32.mrb[11].mxu0 }
 0x23d   :  { %v1356_v30 = vpop.f32.mrb[12].mxu0 }
 0x23e   :  { %v224_v31 = vpop.f32.mrb[13].mxu0 }
 0x23f   :  { %v1357_v33 = vpop.f32.mrb[14].mxu0 }
 0x240   :  { %1049 = vxpose.xlu0.c.b16.cont [4/8] (narrow) %v96_v34, 32  ;;  %v1462_v34 = vpack.c.bf16 %v1737_v17, %v1737_v17  ;;  %v227_v35 = vpop.f32.mrb[15].mxu0 }
 0x244   :  { %1050 = vxpose.xlu0.c.b16.cont [5/8] (narrow) %v97_v37, 32 }
 0x248   :  { %1051 = vxpose.xlu0.c.b16.cont [6/8] (narrow) %v98_v40, 32 }
 0x24c   :  { %1052 = vxpose.xlu0.c.b16.cont [7/8] (narrow) %v99_v43, 32 }
 0x250   :  { %1053 = vxpose.xlu0.c.b16.end [8/8] (narrow) %v100_v46, 32 }
 0x294   :  { %v354_v3 = vpop.xlane.xlu0 %353 }
 0x295   :  { %v355_v8 = vcvt.f32.s32 %v354_v3 }
 0x297   :  { %v358_v9 = vadd.s32 %v357_v6, %v355_v8 }
 0x298   :  { %v369_v10 = vpop.xlane.xlu1 %368 }
 0x299   :  { %v370_v12 = vcvt.f32.s32 %v369_v10  ;;  %vm652_vm10 = vcmp.eq.s32.totalorder %v1652_v18, %v358_v9  ;;  %v1113_v10 = vld [vmem:[#allocation4 + $0x10] sm:$0xff] }
 0x29a   :  { %v1212_v13 = vsel %vm652_vm10, 1.0, %v1572_v62  ;;  %v1054_v44 = vpop.trf.xlu0 }
 0x29b   :  { %v373_v15 = vadd.s32 %v372_v11, %v370_v12  ;;  %1366 = vmatprep.mubr.msk.f32.mxu1 %vm65_vm1, %v1212_v13  ;;  %v998_v23 = vsel %vm65_vm1, %v1212_v13, 0.0  ;;  %v1111_v11 = vld [vmem:[#allocation4] sm:$0xff] }
 0x29d   :  { %vm653_vm12 = vcmp.eq.s32.totalorder %v1652_v18, %v373_v15 }
 0x29e   :  { %v1213_v22 = vsel %vm653_vm12, 1.0, %v1572_v62  ;;  %vm1265_vm13 = vmpackc.low %vm653_vm12, %vm652_vm10  ;;  %v1055_v48 = vpop.trf.xlu0 }
 0x29f   :  { %1367 = vmatmul.mubr.msk.f32.vlgmr.msra.gmra.mrb[0].mxu1 %vm65_vm1, %v1213_v22  ;;  %v1458_v24 = vpack.c.bf16 %v1213_v22, %v1212_v13  ;;  %v999_v25 = vsel %vm65_vm1, %v1213_v22, 0.0  ;;  %1425 = vmatprep.subr.msk.bf16.mxu1 %vm1265_vm13, %v1575_v27  ;;  %v1114_v13 = vld [vmem:[#allocation4 + $0x18] sm:$0xff] }
 0x2a0   :  { %v1000_v28 = vadd.f32 %v999_v25, %v998_v23  ;;  %1426 = vmatpush3.bf16.msk.msra.mxu1 %vm1265_vm13, %v1575_v27  ;;  %1369 = vmatprep.mubr.msk.f32.mxu1 %vm65_vm1, %v1737_v17 }
 0x2a1   :  { %1460 = vmatpush3.bf16.xpose.msk.msra.mxu0 %vm1708_vm4, %v1458_v24  ;;  %1427 = vmatprep.subr.msk.bf16.mxu1 %vm1739_vm11, %v1575_v27 }
 0x2a2   :  { %v1002_v29 = vadd.f32 %v1001_v26, %v1000_v28  ;;  %1461 = vmatprep.subr.bf16.mxu0 %v1573_v63 }
 0x2a3   :  { %1370 = vmatmul.mubr.msk.f32.gmra.mrb[2].mxu1 %vm65_vm1, %v1737_v17 }
 0x2a4   :  { %v1004_v32 = vadd.f32 %v1002_v29, %v1001_v26  ;;  %1428 = vmatpush3.bf16.msk.msra.mxu1 %vm1739_vm11, %v1575_v27  ;;  %1372 = vmatprep.mubr.msk.f32.mxu1 %vm65_vm1, %v1737_v17 }
 0x2a5   :  { %1429 = vmatprep.subr.msk.bf16.mxu1 %vm1739_vm11, %v1575_v27 }
 0x2a6   :  { %v1006_v36 = vadd.f32 %v1004_v32, %v1001_v26 }
 0x2a7   :  { %1373 = vmatmul.mubr.msk.f32.gmra.mrb[4].mxu1 %vm65_vm1, %v1737_v17 }
 0x2a8   :  { %v1008_v37 = vadd.f32 %v1006_v36, %v1001_v26  ;;  %1430 = vmatpush3.bf16.msk.msra.mxu1 %vm1739_vm11, %v1575_v27  ;;  %1375 = vmatprep.mubr.msk.f32.mxu1 %vm65_vm1, %v1737_v17 }
 0x2a9   :  { %1464 = vmatpush3.bf16.xpose.msk.msra.mxu0 %vm1708_vm4, %v1462_v34  ;;  %1431 = vmatprep.subr.msk.bf16.mxu1 %vm1739_vm11, %v1575_v27 }
 0x2aa   :  { %v1010_v38 = vadd.f32 %v1008_v37, %v1001_v26  ;;  %1465 = vmatprep.subr.bf16.mxu0 %v1573_v63 }
 0x2ab   :  { %1376 = vmatmul.mubr.msk.f32.gmra.mrb[6].mxu1 %vm65_vm1, %v1737_v17 }
 0x2ac   :  { %v1012_v39 = vadd.f32 %v1010_v38, %v1001_v26  ;;  %1432 = vmatpush3.bf16.msk.msra.mxu1 %vm1739_vm11, %v1575_v27  ;;  %1378 = vmatprep.mubr.msk.f32.mxu1 %vm65_vm1, %v1737_v17 }
 0x2ad   :  { %1433 = vmatprep.subr.msk.bf16.mxu1 %vm1739_vm11, %v1575_v27 }
 0x2ae   :  { %v1014_v40 = vadd.f32 %v1012_v39, %v1001_v26 }
 0x2af   :  { %1379 = vmatmul.mubr.msk.f32.gmra.mrb[8].mxu1 %vm65_vm1, %v1737_v17 }
 0x2b0   :  { %v1016_v41 = vadd.f32 %v1014_v40, %v1001_v26  ;;  %1434 = vmatpush3.bf16.msk.msra.mxu1 %vm1739_vm11, %v1575_v27  ;;  %1381 = vmatprep.mubr.msk.f32.mxu1 %vm65_vm1, %v1737_v17 }
 0x2b1   :  { %1468 = vmatpush3.bf16.xpose.msk.msra.mxu0 %vm1708_vm4, %v1462_v34  ;;  %1435 = vmatprep.subr.msk.bf16.mxu1 %vm1739_vm11, %v1575_v27 }
 0x2b2   :  { %1469 = vmatprep.subr.bf16.mxu0 %v1573_v63  ;;  %v1018_v42 = vadd.f32 %v1016_v41, %v1001_v26 }
 0x2b3   :  { %1382 = vmatmul.mubr.msk.f32.gmra.mrb[10].mxu1 %vm65_vm1, %v1737_v17 }
 0x2b4   :  { %1436 = vmatpush3.bf16.msk.msra.mxu1 %vm1739_vm11, %v1575_v27  ;;  %1384 = vmatprep.mubr.msk.f32.mxu1 %vm65_vm1, %v1737_v17  ;;  %v1020_v43 = vadd.f32 %v1018_v42, %v1001_v26 }
 0x2b5   :  { %1437 = vmatprep.subr.msk.bf16.mxu1 %vm1739_vm11, %v1575_v27 }
 0x2b6   :  { %v1022_v45 = vadd.f32 %v1020_v43, %v1001_v26 }
 0x2b7   :  { %1385 = vmatmul.mubr.msk.f32.gmra.mrb[12].mxu1 %vm65_vm1, %v1737_v17 }
 0x2b8   :  { %1438 = vmatpush3.bf16.msk.msra.mxu1 %vm1739_vm11, %v1575_v27  ;;  %1387 = vmatprep.mubr.msk.f32.mxu1 %vm65_vm1, %v1737_v17  ;;  %v1024_v46 = vadd.f32 %v1022_v45, %v1001_v26 }
 0x2b9   :  { %1472 = vmatpush3.bf16.xpose.msk.msra.mxu0 %vm1708_vm4, %v1462_v34  ;;  %1439 = vmatprep.subr.msk.bf16.mxu1 %vm1739_vm11, %v1575_v27 }
 0x2ba   :  { %1473 = vmatprep.subr.bf16.mxu0 %v1573_v63  ;;  %v1026_v47 = vadd.f32 %v1024_v46, %v1001_v26 }
 0x2bb   :  { %1388 = vmatmul.mubr.msk.f32.gmra.mrb[14].mxu1 %vm65_vm1, %v1737_v17 }
 0x2bc   :  { %1440 = vmatpush3.bf16.msk.msra.mxu1 %vm1739_vm11, %v1575_v27  ;;  %1441 = vmatprep.mubr.bf16.mxu1 %v1054_v44  ;;  %v1028_v50 = vadd.f32 %v1026_v47, %v1001_v26 }
 0x2be   :  { %v1029_v51 = vrot.slane %v1028_v50, 4 }
 0x2bf   :  { %1442 = vmatmul.mubr.bf16.vlgmr.msra.gmra.mrb[16].mxu1 %v1055_v48 }
 0x2c0   :  { %v1030_v52 = vadd.f32 %v1029_v51, %v1028_v50 }
 0x2c1   :  { %1476 = vmatpush3.bf16.xpose.msk.msra.mxu0 %vm1708_vm4, %v1462_v34 }
 0x2c2   :  { %1477 = vmatprep.subr.bf16.mxu0 %v1573_v63  ;;  %v1031_v53 = vrot.slane %v1030_v52, 2 }
 0x2c4   :  { %v1032_v54 = vadd.f32 %v1031_v53, %v1030_v52 }
 0x2c6   :  { %v1033_v55 = vrot.slane %v1032_v54, 1 }
 0x2c8   :  { %v1034_v57 = vadd.f32 %v1033_v55, %v1032_v54 }
 0x2c9   :  { %1480 = vmatpush3.bf16.xpose.msk.msra.mxu0 %vm1708_vm4, %v1462_v34 }
 0x2ca   :  { %1481 = vmatprep.subr.bf16.mxu0 %v1573_v63  ;;  %v1035_v58 = vadd.f32 %v1034_v57, %v997_v56 }
 0x2cc   :  { %1037 = vst.msk [vmem:[#allocation6] sm:$0x1] %vm70_vm7, %v1035_v58 }
 0x2d1   :  { %1484 = vmatpush3.bf16.xpose.msk.msra.mxu0 %vm1708_vm4, %v1462_v34 }
 0x2d2   :  { %1485 = vmatprep.subr.bf16.mxu0 %v1573_v63 }
 0x2d9   :  { %1488 = vmatpush3.bf16.xpose.msk.msra.mxu0 %vm1708_vm4, %v1462_v34 }
 0x2e0   :  { %1423 = vmatmul.mubr.msk.f32.vlgmr.msra.gmra.mrb[16].mxu0 %vm65_vm1, %v921_v59 }
 0x372   :  { %v1368_v60 = vpop.f32.mrb[0].mxu1 }
 0x373   :  { %906 = vst.msk [vmem:[%s1949_s4 + $0x8] sm:$0xff] %vm117_vm0, %v1368_v60  ;;  %v826_v61 = vpop.f32.mrb[1].mxu1 }
 0x374   :  { %905 = vst.msk [vmem:[%s1949_s4] sm:$0xff] %vm117_vm0, %v826_v61 }
 0x376   :  { %v1371_v62 = vpop.f32.mrb[2].mxu1 }
 0x377   :  { %908 = vst.msk [vmem:[%s1949_s4 + $0x18] sm:$0xff] %vm117_vm0, %v1371_v62  ;;  %v836_v18 = vpop.f32.mrb[3].mxu1 }
 0x378   :  { %907 = vst.msk [vmem:[%s1949_s4 + $0x10] sm:$0xff] %vm117_vm0, %v836_v18 }
 0x37a   :  { %v1374_v49 = vpop.f32.mrb[4].mxu1 }
 0x37b   :  { %910 = vst.msk [vmem:[%s1949_s4 + $0x28] sm:$0xff] %vm117_vm0, %v1374_v49  ;;  %v846_v63 = vpop.f32.mrb[5].mxu1 }
 0x37c   :  { %909 = vst.msk [vmem:[%s1949_s4 + $0x20] sm:$0xff] %vm117_vm0, %v846_v63 }
 0x37e   :  { %v1377_v0 = vpop.f32.mrb[6].mxu1 }
 0x37f   :  { %912 = vst.msk [vmem:[%s1949_s4 + $0x38] sm:$0xff] %vm117_vm0, %v1377_v0  ;;  %v856_v1 = vpop.f32.mrb[7].mxu1 }
 0x380   :  { %911 = vst.msk [vmem:[%s1949_s4 + $0x30] sm:$0xff] %vm117_vm0, %v856_v1 }
 0x382   :  { %v1380_v2 = vpop.f32.mrb[8].mxu1 }
 0x383   :  { %914 = vst.msk [vmem:[%s1949_s4 + $0x48] sm:$0xff] %vm117_vm0, %v1380_v2  ;;  %v866_v3 = vpop.f32.mrb[9].mxu1 }
 0x384   :  { %913 = vst.msk [vmem:[%s1949_s4 + $0x40] sm:$0xff] %vm117_vm0, %v866_v3 }
 0x386   :  { %v1383_v5 = vpop.f32.mrb[10].mxu1 }
 0x387   :  { %916 = vst.msk [vmem:[%s1949_s4 + $0x58] sm:$0xff] %vm117_vm0, %v1383_v5  ;;  %v876_v6 = vpop.f32.mrb[11].mxu1 }
 0x388   :  { %915 = vst.msk [vmem:[%s1949_s4 + $0x50] sm:$0xff] %vm117_vm0, %v876_v6 }
 0x38a   :  { %v1386_v4 = vpop.f32.mrb[12].mxu1 }
 0x38b   :  { %918 = vst.msk [vmem:[%s1949_s4 + $0x68] sm:$0xff] %vm117_vm0, %v1386_v4  ;;  %v886_v8 = vpop.f32.mrb[13].mxu1 }
 0x38c   :  { %917 = vst.msk [vmem:[%s1949_s4 + $0x60] sm:$0xff] %vm117_vm0, %v886_v8 }
 0x38e   :  { %v1389_v7 = vpop.f32.mrb[14].mxu1 }
 0x38f   :  { %920 = vst.msk [vmem:[%s1949_s4 + $0x78] sm:$0xff] %vm117_vm0, %v1389_v7  ;;  %v896_v9 = vpop.f32.mrb[15].mxu1 }
 0x390   :  { %919 = vst.msk [vmem:[%s1949_s4 + $0x70] sm:$0xff] %vm117_vm0, %v896_v9  ;;  %s1502_s4 = scalar_lea.vmem %s1152_s24, 512 }
 0x391   :  { %p1503_p0 = scmp.ne.s32.totalorder %s1152_s24, %s1502_s4  ;;  %p1508_p2 = scmp.lt.s32.totalorder %s1502_s4, %s1502_s4 }
 0x392   :  { %v1443_v12 = vpop.f32.mrb[16].mxu1 }
 0x393   :  { %v1117_v14 = vadd.f32 %v1443_v12, %v1113_v10  ;;  %v1096_v15 = vpop.f32.mrb[17].mxu1  ;;  %p1509_p3 = por %p1508_p2, %p1507_p1 }
 0x394   :  { %v1115_v17 = vadd.f32 %v1111_v11, %v1096_v15  ;;  %v1444_v19 = vpop.f32.mrb[18].mxu1 }
 0x395   :  { %1121 = vst.msk [vmem:[#allocation4 + $0x10] sm:$0xff] %vm65_vm1, %v1117_v14  ;;  %v1118_v20 = vadd.f32 %v1444_v19, %v1114_v13  ;;  %v1099_v21 = vpop.f32.mrb[19].mxu1  ;;  %p1510_p4 = pnand %p1509_p3, %p1503_p0 }
 0x396   :  { %1119 = vst.msk [vmem:[#allocation4] sm:$0xff] %vm65_vm1, %v1115_v17  ;;  %v1116_v22 = vadd.f32 %v1112_v16, %v1099_v21 }
 0x397   :  { %1122 = vst.msk [vmem:[#allocation4 + $0x18] sm:$0xff] %vm65_vm1, %v1118_v20 }
 0x398   :  { %1120 = vst.msk [vmem:[#allocation4 + $0x8] sm:$0xff] %vm65_vm1, %v1116_v22 }
 0x399   :  { %1513 = shalt.err (!%p1510_p4)
}
 0x39a   :  { %s1514_s29 = scalar_lea.hbm %s1951_s6, 512 }
 0x39b   :  { %p1515_p5 = scmp.ne.s32.totalorder %s1951_s6, %s1514_s29  ;;  %p1518_p6 = scmp.lt.u32.totalorder %s1514_s29, %s1951_s6 }
 0x39d   :  { %p1520_p7 = pnand %p1518_p6, %p1515_p5 }
 0x39f   :  { %1523 = shalt.err (!%p1520_p7)
}
 0x3a0   :  { %s1578_s11 = smov 128   ;;  %s1579_s12 = smov 8  }
 0x3a1   :  { %1157 = dma.vmem_to_hbm [thread:$0]  %s1152_s24, 512, %s1951_s6, [#allocation5], %s1578_s11, %s1578_s11, %s1579_s12  }
 0x3a2   :  { %s1524_s3 = scalar_lea.vmem %s1900_s26, 16  ;;  %s1528_s14 = scalar_lea.vmem %s1900_s26, 32 }
 0x3a3   :  { %p1525_p8 = scmp.ne.s32.totalorder %s1900_s26, %s1524_s3  ;;  %p1529_p9 = scmp.lt.s32.totalorder %s1900_s26, %s1900_s26 }
 0x3a4   :  { %p1530_p10 = scmp.lt.s32.totalorder %s1528_s14, %s1524_s3 }
 0x3a6   :  { %p1531_p11 = por %p1530_p10, %p1529_p9 }
 0x3a8   :  { %p1532_p12 = pnand %p1531_p11, %p1525_p8 }
 0x3aa   :  { %1535 = shalt.err (!%p1532_p12)
}
 0x3ab   :  { %s1536_s16 = scalar_lea.hbm %s1952_s7, 16 }
 0x3ac   :  { %p1537_p13 = scmp.ne.s32.totalorder %s1952_s7, %s1536_s16  ;;  %p1540_p0 = scmp.lt.u32.totalorder %s1536_s16, %s1952_s7 }
 0x3ae   :  { %p1542_p1 = pnand %p1540_p0, %p1537_p13 }
 0x3b0   :  { %1545 = shalt.err (!%p1542_p1)
}
 0x3b1   :  { %1167 = dma.vmem_to_hbm [thread:$0]  %s1900_s26, 16, %s1952_s7, [#allocation5]  }
 0x3b2   :  { %s1580_s21 = smov [#allocation2]  }
 0x3b3   :  { %v991_v23 = vpop.f32.mrb[16].mxu0  ;;  %s1142_s22 = sshll.u32 %s1580_s21, 4  ;;  %s1143_s22 = int_to_ptr.vmem [resolvable:$true] %s1142_s22 }
 0x3b4   :  { %v1489_v24 = vtrunc.f32 %v991_v23  ;;  %v1424_v25 = vpop.f32.mrb[17].mxu0  ;;  %s1546_s23 = scalar_lea.vmem %s1143_s22, 16  ;;  %s1550_s24 = scalar_lea.vmem %s1143_s22, 32 }
 0x3b5   :  { %p1547_p2 = scmp.ne.s32.totalorder %s1143_s22, %s1546_s23  ;;  %p1551_p3 = scmp.lt.s32.totalorder %s1143_s22, %s1143_s22 }
 0x3b6   :  { %v1490_v26 = vcvt.f32.s32 %v1489_v24  ;;  %p1552_p4 = scmp.lt.s32.totalorder %s1550_s24, %s1546_s23 }
 0x3b8   :  { %996 = vst [vmem:[#allocation2] sm:$0x1] %v1490_v26  ;;  %p1553_p5 = por %p1552_p4, %p1551_p3 }
 0x3ba   :  { %p1554_p6 = pnand %p1553_p5, %p1547_p2 }
 0x3bc   :  { %1557 = shalt.err (!%p1554_p6)
}
 0x3bd   :  { %s1558_s7 = scalar_lea.hbm %s1950_s5, 16 }
 0x3be   :  { %p1559_p7 = scmp.ne.s32.totalorder %s1950_s5, %s1558_s7  ;;  %p1562_p8 = scmp.lt.u32.totalorder %s1558_s7, %s1950_s5 }
 0x3c0   :  { %p1564_p9 = pnand %p1562_p8, %p1559_p7 }
 0x3c2   :  { %1567 = shalt.err (!%p1564_p9)
}
 0x3c3   :  { %1145 = dma.vmem_to_hbm [thread:$0]  %s1143_s22, 16, %s1950_s5, [#allocation3]  }
 0x3c4   :  { %1568 = dma.done.wait [#allocation3], 16  }
 0x3c5   :  { %1569 = vsyncadd [#allocation3], 4294967280 }
 0x3c6   :  { %1570 = dma.done.wait [#allocation5], 528  }
 0x3c7   :  { %1571 = vsyncadd [#allocation5], 4294966768 }
 0x3c8   :  { %1185 = vsyncpa [#allocation3], 1 }
 0x3c9   :  { %1186 = vsyncpa [#allocation5], 1 }

</bundles_post_ra>
